<compile_context>
chip_gen: v7x
topology: tpu7x:2x2x1
jax: 0.10.0
libtpu: 0.0.40
codegen_flags: <defaults>
</compile_context>

<pallas_src>
import jax
import jax.numpy as jnp
from jax.experimental import pallas as pl
from jax.experimental.pallas import tpu as pltpu


def _round_up(x, m):
    return (x + m - 1) // m * m


# ---------------------------------------------------------------------------
# Kernel (feature-major: activations are (features, batch_tile))
# ---------------------------------------------------------------------------
def mlp_kernel(xt_ref,
               w1_ref, b1_ref,
               w2_ref, b2_ref,
               w3_ref, b3_ref,
               w4_ref, b4_ref,
               o_ref):
    # Layer 1: (128, din) @ (din, tile_b) -> (128, tile_b), bf16 MXU, f32 accumulate.
    h = jnp.dot(w1_ref[...], xt_ref[...], preferred_element_type=jnp.float32)
    h = jnp.maximum(h + b1_ref[...], 0.0)          # folded-BN bias + ReLU (dropout = id)

    # Layer 2: (64, 128) @ (128, tile_b) -> (64, tile_b)
    h = jnp.dot(w2_ref[...], h.astype(jnp.bfloat16),
                preferred_element_type=jnp.float32)
    h = jnp.maximum(h + b2_ref[...], 0.0)

    # Layer 3: (32, 64) @ (64, tile_b) -> (32, tile_b)
    h = jnp.dot(w3_ref[...], h.astype(jnp.bfloat16),
                preferred_element_type=jnp.float32)
    h = jnp.maximum(h + b3_ref[...], 0.0)

    # Head (32 -> 1): VPU multiply + sublane (XLU) reduction -> (1, tile_b) lane-dense
    # row (no 1-lane MXU matmul, no masked column stores).
    o_ref[...] = jnp.sum(h * w4_ref[...], axis=0, keepdims=True) + b4_ref[...]


# ---------------------------------------------------------------------------
# Parameter preparation (fold eval-mode BN, transpose to feature-major, cast)
# ---------------------------------------------------------------------------
def prepare_params(params):
    """Fold eval-mode BatchNorm into the Linear layers (f32 math), store weights
    feature-major (out_features, in_features) in bf16, biases as (out, 1) columns.

    params holds w{l} as (in_features, out_features); s{l}/t{l} are the folded BN
    scale/shift: s = gamma/sqrt(running_var+eps), t = beta - running_mean*s.
    """
    p = {}
    for li in (1, 2, 3):
        s = params[f"s{li}"]                                     # (1, dout)
        t = params[f"t{li}"]                                     # (1, dout)
        w = params[f"w{li}"] * s                                 # (din, dout) f32
        b = params[f"b{li}"] * s + t                             # (1, dout)  f32
        p[f"w{li}"] = jnp.asarray(w.T, jnp.bfloat16)             # (dout, din)
        p[f"b{li}"] = jnp.asarray(b.reshape(-1, 1), jnp.float32)  # (dout, 1)
    # Head kept in f32 for the VPU/XLU reduction path.
    p["w4"] = jnp.asarray(params["w4"].reshape(-1, 1), jnp.float32)  # (32, 1)
    p["b4"] = jnp.asarray(params["b4"].reshape(1, 1), jnp.float32)   # (1, 1)
    return p


def _vmem_limit_bytes(tile_b, input_size):
    bf16, f32 = 2, 4
    x_tiles = 2 * input_size * tile_b * bf16                     # double-buffered x^T tile
    out_tiles = 2 * tile_b * f32                                 # double-buffered out row
    weights = 2 * bf16 * (128 * input_size + 64 * 128 + 32 * 64)
    small = 2 * f32 * (128 + 64 + 32 + 32 + 1)                   # biases + head
    acts = tile_b * (128 + 64 + 32 + 1) * f32                    # live intermediates
    total = x_tiles + out_tiles + weights + small + acts + (8 << 20)
    return int(min(total, 64 << 20))                             # safe on v7x's 64 MiB VMEM


# ---------------------------------------------------------------------------
# Wrapper
# ---------------------------------------------------------------------------
def simplified_binary_classification_forward(x, prepared, *, tile_b=512):
    """x: (B, input_size) float. prepared: output of prepare_params(). Returns (B, 1) f32."""
    B, input_size = x.shape

    if B <= tile_b:
        tile_b = _round_up(B, 8)          # single grid step, minimal padding
        pad_b = tile_b
    else:
        tile_b = _round_up(tile_b, 128)   # lane-aligned batch tiles
        pad_b = _round_up(B, tile_b)

    # Layout plumbing: feature-major input (input_size, pad_b), bf16 for the MXU.
    xt = x.astype(jnp.bfloat16).T                                # (input_size, B)
    if pad_b != B:
        xt = jnp.pad(xt, ((0, 0), (0, pad_b - B)))
    grid = (pad_b // tile_b,)

    def wspec(shape):
        # Full-array block, constant index_map -> stays VMEM-resident across grid steps.
        return pl.BlockSpec(shape, lambda i: (0, 0))

    flops = 2 * B * (input_size * 128 + 128 * 64 + 64 * 32 + 32)
    bytes_accessed = (
        pad_b * input_size * 2                                   # x (bf16)
        + 2 * (input_size * 128 + 128 * 64 + 64 * 32)            # weights (bf16)
        + 4 * (128 + 64 + 32 + 32 + 1)                           # biases + head (f32)
        + pad_b * 4                                              # output (f32)
    )

    out = pl.pallas_call(
        mlp_kernel,
        out_shape=jax.ShapeDtypeStruct((1, pad_b), jnp.float32),
        grid=grid,
        in_specs=[
            pl.BlockSpec((input_size, tile_b), lambda i: (0, i)),  # x^T: tiled on batch lanes
            wspec((128, input_size)), wspec((128, 1)),
            wspec((64, 128)),         wspec((64, 1)),
            wspec((32, 64)),          wspec((32, 1)),
            wspec((32, 1)),           wspec((1, 1)),
        ],
        out_specs=pl.BlockSpec((1, tile_b), lambda i: (0, i)),     # lane-dense output row
        compiler_params=pltpu.CompilerParams(
            dimension_semantics=("parallel",),                     # megacore on v7x
            vmem_limit_bytes=_vmem_limit_bytes(tile_b, input_size),
        ),
        cost_estimate=pl.CostEstimate(
            flops=flops, transcendentals=0, bytes_accessed=bytes_accessed),
    )(
        xt,
        prepared["w1"], prepared["b1"],
        prepared["w2"], prepared["b2"],
        prepared["w3"], prepared["b3"],
        prepared["w4"], prepared["b4"],
    )
    return out[0, :B].reshape(B, 1)


# ---------------------------------------------------------------------------
# Synthetic parameters matching the PyTorch module's shapes + pure-JAX reference
# ---------------------------------------------------------------------------
def init_params(key, input_size):
    """PyTorch nn.Linear weight is (out, in); we store the transpose (in, out).

    BatchNorm represented by folded eval-mode scale/shift:
      s = gamma / sqrt(running_var + eps),  t = beta - running_mean * s
    """
    dims = [(input_size, 128), (128, 64), (64, 32), (32, 1)]
    keys = jax.random.split(key, 16)
    p = {}
    ki = 0
    for li, (din, dout) in enumerate(dims, start=1):
        scale = 1.0 / jnp.sqrt(jnp.float32(din))
        p[f"w{li}"] = (jax.random.uniform(keys[ki], (din, dout), jnp.float32,
                                          minval=-1.0, maxval=1.0) * scale)
        ki += 1
        p[f"b{li}"] = (jax.random.uniform(keys[ki], (1, dout), jnp.float32,
                                          minval=-1.0, maxval=1.0) * scale)
        ki += 1
    eps = 1e-5
    for li, dout in zip((1, 2, 3), (128, 64, 32)):
        gamma = 1.0 + 0.1 * jax.random.normal(keys[ki], (1, dout), jnp.float32); ki += 1
        beta = 0.1 * jax.random.normal(keys[ki], (1, dout), jnp.float32); ki += 1
        running_mean = jnp.zeros((1, dout), jnp.float32)
        running_var = jnp.ones((1, dout), jnp.float32)
        s = gamma / jnp.sqrt(running_var + eps)
        t = beta - running_mean * s
        p[f"s{li}"] = s
        p[f"t{li}"] = t
    return p


def reference_forward(x, params):
    """Eval-mode reference in f32 (Linear -> BN(running stats) -> ReLU; dropout = id)."""
    h = x
    for li in (1, 2, 3):
        h = h @ params[f"w{li}"] + params[f"b{li}"]
        h = h * params[f"s{li}"] + params[f"t{li}"]
        h = jnp.maximum(h, 0.0)
    return h @ params["w4"] + params["b4"]


if __name__ == "__main__":
    batch = 8
    input_size = 32

    key = jax.random.PRNGKey(0)
    k_x, k_p = jax.random.split(key)
    x = jax.random.normal(k_x, (batch, input_size), jnp.float32)
    params = init_params(k_p, input_size)
    prepared = prepare_params(params)   # fold BN + transpose + cast once, outside hot path

    out = simplified_binary_classification_forward(x, prepared)
    jax.block_until_ready(out)

    assert out.shape == (batch, 1) and out.dtype == jnp.float32
    ref = reference_forward(x, params)
    err = float(jnp.max(jnp.abs(out - ref)))
    assert err < 1e-1, f"max abs error vs f32 reference too large: {err}"
    print("KERNEL_OK")
</pallas_src>

<mosaic_0001>
module attributes {stable_mosaic.version = 11 : i64} {
  func.func @mlp_kernel(%arg0: i32, %arg1: memref<32x8xbf16, #tpu.memory_space<vmem>>, %arg2: memref<128x32xbf16, #tpu.memory_space<vmem>>, %arg3: memref<128x1xf32, #tpu.memory_space<vmem>>, %arg4: memref<64x128xbf16, #tpu.memory_space<vmem>>, %arg5: memref<64x1xf32, #tpu.memory_space<vmem>>, %arg6: memref<32x64xbf16, #tpu.memory_space<vmem>>, %arg7: memref<32x1xf32, #tpu.memory_space<vmem>>, %arg8: memref<32x1xf32, #tpu.memory_space<vmem>>, %arg9: memref<1x1xf32, #tpu.memory_space<vmem>>, %arg10: memref<1x8xf32, #tpu.memory_space<vmem>>) attributes {dimension_semantics = [#tpu.dimension_semantics<parallel>], iteration_bounds = array<i64: 1>, scalar_prefetch = 0 : i64, scratch_operands = 0 : i64, tpu.core_type = #tpu.core_type<tc>, window_params = [{transform_indices = @transform_0, window_bounds = array<i64: 32, 8>}, {pipeline_mode = #tpu.pipeline_mode<synchronous>, transform_indices = @transform_1, window_bounds = array<i64: 128, 32>}, {pipeline_mode = #tpu.pipeline_mode<synchronous>, transform_indices = @transform_2, window_bounds = array<i64: 128, 1>}, {pipeline_mode = #tpu.pipeline_mode<synchronous>, transform_indices = @transform_3, window_bounds = array<i64: 64, 128>}, {pipeline_mode = #tpu.pipeline_mode<synchronous>, transform_indices = @transform_4, window_bounds = array<i64: 64, 1>}, {pipeline_mode = #tpu.pipeline_mode<synchronous>, transform_indices = @transform_5, window_bounds = array<i64: 32, 64>}, {pipeline_mode = #tpu.pipeline_mode<synchronous>, transform_indices = @transform_6, window_bounds = array<i64: 32, 1>}, {pipeline_mode = #tpu.pipeline_mode<synchronous>, transform_indices = @transform_7, window_bounds = array<i64: 32, 1>}, {pipeline_mode = #tpu.pipeline_mode<synchronous>, transform_indices = @transform_8, window_bounds = array<i64: 1, 1>}, {transform_indices = @transform_9, window_bounds = array<i64: 1, 8>}]} {
    %c0 = arith.constant 0 : index
    %c0_0 = arith.constant 0 : index
    %0 = vector.load %arg2[%c0, %c0_0] : memref<128x32xbf16, #tpu.memory_space<vmem>>, vector<128x32xbf16>
    %c0_1 = arith.constant 0 : index
    %c0_2 = arith.constant 0 : index
    %1 = vector.load %arg1[%c0_1, %c0_2] : memref<32x8xbf16, #tpu.memory_space<vmem>>, vector<32x8xbf16>
    %cst = arith.constant dense<0.000000e+00> : vector<128x8xf32>
    %2 = tpu.matmul %0, %1, %cst {dimension_numbers = #tpu.dot_dimension_numbers<[1], [0], [0], [1], [0, 0, 1, 1], [], []>} : vector<128x32xbf16>, vector<32x8xbf16>, vector<128x8xf32> -> vector<128x8xf32>
    %c0_3 = arith.constant 0 : index
    %c0_4 = arith.constant 0 : index
    %3 = vector.load %arg3[%c0_3, %c0_4] : memref<128x1xf32, #tpu.memory_space<vmem>>, vector<128x1xf32>
    %4 = vector.broadcast %3 : vector<128x1xf32> to vector<128x8xf32>
    %5 = arith.addf %2, %4 : vector<128x8xf32>
    %cst_5 = arith.constant 0.000000e+00 : f32
    %6 = vector.broadcast %cst_5 : f32 to vector<128x8xf32>
    %7 = arith.maximumf %5, %6 : vector<128x8xf32>
    %c0_6 = arith.constant 0 : index
    %c0_7 = arith.constant 0 : index
    %8 = vector.load %arg4[%c0_6, %c0_7] : memref<64x128xbf16, #tpu.memory_space<vmem>>, vector<64x128xbf16>
    %9 = arith.truncf %7 : vector<128x8xf32> to vector<128x8xbf16>
    %cst_8 = arith.constant dense<0.000000e+00> : vector<64x8xf32>
    %10 = tpu.matmul %8, %9, %cst_8 {dimension_numbers = #tpu.dot_dimension_numbers<[1], [0], [0], [1], [0, 0, 1, 1], [], []>} : vector<64x128xbf16>, vector<128x8xbf16>, vector<64x8xf32> -> vector<64x8xf32>
    %c0_9 = arith.constant 0 : index
    %c0_10 = arith.constant 0 : index
    %11 = vector.load %arg5[%c0_9, %c0_10] : memref<64x1xf32, #tpu.memory_space<vmem>>, vector<64x1xf32>
    %12 = vector.broadcast %11 : vector<64x1xf32> to vector<64x8xf32>
    %13 = arith.addf %10, %12 : vector<64x8xf32>
    %cst_11 = arith.constant 0.000000e+00 : f32
    %14 = vector.broadcast %cst_11 : f32 to vector<64x8xf32>
    %15 = arith.maximumf %13, %14 : vector<64x8xf32>
    %c0_12 = arith.constant 0 : index
    %c0_13 = arith.constant 0 : index
    %16 = vector.load %arg6[%c0_12, %c0_13] : memref<32x64xbf16, #tpu.memory_space<vmem>>, vector<32x64xbf16>
    %17 = arith.truncf %15 : vector<64x8xf32> to vector<64x8xbf16>
    %cst_14 = arith.constant dense<0.000000e+00> : vector<32x8xf32>
    %18 = tpu.matmul %16, %17, %cst_14 {dimension_numbers = #tpu.dot_dimension_numbers<[1], [0], [0], [1], [0, 0, 1, 1], [], []>} : vector<32x64xbf16>, vector<64x8xbf16>, vector<32x8xf32> -> vector<32x8xf32>
    %c0_15 = arith.constant 0 : index
    %c0_16 = arith.constant 0 : index
    %19 = vector.load %arg7[%c0_15, %c0_16] : memref<32x1xf32, #tpu.memory_space<vmem>>, vector<32x1xf32>
    %20 = vector.broadcast %19 : vector<32x1xf32> to vector<32x8xf32>
    %21 = arith.addf %18, %20 : vector<32x8xf32>
    %cst_17 = arith.constant 0.000000e+00 : f32
    %22 = vector.broadcast %cst_17 : f32 to vector<32x8xf32>
    %23 = arith.maximumf %21, %22 : vector<32x8xf32>
    %c0_18 = arith.constant 0 : index
    %c0_19 = arith.constant 0 : index
    %24 = vector.load %arg8[%c0_18, %c0_19] : memref<32x1xf32, #tpu.memory_space<vmem>>, vector<32x1xf32>
    %25 = vector.broadcast %24 : vector<32x1xf32> to vector<32x8xf32>
    %26 = arith.mulf %23, %25 : vector<32x8xf32>
    %cst_20 = arith.constant dense<0.000000e+00> : vector<8xf32>
    %27 = vector.multi_reduction <add>, %26, %cst_20 [0] : vector<32x8xf32> to vector<8xf32>
    %28 = vector.shape_cast %27 : vector<8xf32> to vector<1x8xf32>
    %c0_21 = arith.constant 0 : index
    %c0_22 = arith.constant 0 : index
    %29 = vector.load %arg9[%c0_21, %c0_22] : memref<1x1xf32, #tpu.memory_space<vmem>>, vector<1x1xf32>
    %30 = vector.broadcast %29 : vector<1x1xf32> to vector<1x8xf32>
    %31 = arith.addf %28, %30 : vector<1x8xf32>
    %c0_23 = arith.constant 0 : index
    %c0_24 = arith.constant 0 : index
    %32 = vector.load %arg10[%c0_23, %c0_24] : memref<1x8xf32, #tpu.memory_space<vmem>>, vector<1x8xf32>
    tpu.vector_store %arg10[%c0_23, %c0_24], %31 {strides = array<i32>} : memref<1x8xf32, #tpu.memory_space<vmem>>, vector<1x8xf32>,
    return
  }
  func.func @transform_0(%arg0: i32) -> (i32, i32) {
    %c0_i32 = arith.constant 0 : i32
    %c0_i32_0 = arith.constant 0 : i32
    return %c0_i32, %arg0 : i32, i32
  }
  func.func @transform_1(%arg0: i32) -> (i32, i32) {
    %c0_i32 = arith.constant 0 : i32
    %c0_i32_0 = arith.constant 0 : i32
    %c0_i32_1 = arith.constant 0 : i32
    return %c0_i32, %c0_i32_0 : i32, i32
  }
  func.func @transform_2(%arg0: i32) -> (i32, i32) {
    %c0_i32 = arith.constant 0 : i32
    %c0_i32_0 = arith.constant 0 : i32
    %c0_i32_1 = arith.constant 0 : i32
    return %c0_i32, %c0_i32_0 : i32, i32
  }
  func.func @transform_3(%arg0: i32) -> (i32, i32) {
    %c0_i32 = arith.constant 0 : i32
    %c0_i32_0 = arith.constant 0 : i32
    %c0_i32_1 = arith.constant 0 : i32
    return %c0_i32, %c0_i32_0 : i32, i32
  }
  func.func @transform_4(%arg0: i32) -> (i32, i32) {
    %c0_i32 = arith.constant 0 : i32
    %c0_i32_0 = arith.constant 0 : i32
    %c0_i32_1 = arith.constant 0 : i32
    return %c0_i32, %c0_i32_0 : i32, i32
  }
  func.func @transform_5(%arg0: i32) -> (i32, i32) {
    %c0_i32 = arith.constant 0 : i32
    %c0_i32_0 = arith.constant 0 : i32
    %c0_i32_1 = arith.constant 0 : i32
    return %c0_i32, %c0_i32_0 : i32, i32
  }
  func.func @transform_6(%arg0: i32) -> (i32, i32) {
    %c0_i32 = arith.constant 0 : i32
    %c0_i32_0 = arith.constant 0 : i32
    %c0_i32_1 = arith.constant 0 : i32
    return %c0_i32, %c0_i32_0 : i32, i32
  }
  func.func @transform_7(%arg0: i32) -> (i32, i32) {
    %c0_i32 = arith.constant 0 : i32
    %c0_i32_0 = arith.constant 0 : i32
    %c0_i32_1 = arith.constant 0 : i32
    return %c0_i32, %c0_i32_0 : i32, i32
  }
  func.func @transform_8(%arg0: i32) -> (i32, i32) {
    %c0_i32 = arith.constant 0 : i32
    %c0_i32_0 = arith.constant 0 : i32
    %c0_i32_1 = arith.constant 0 : i32
    return %c0_i32, %c0_i32_0 : i32, i32
  }
  func.func @transform_9(%arg0: i32) -> (i32, i32) {
    %c0_i32 = arith.constant 0 : i32
    %c0_i32_0 = arith.constant 0 : i32
    return %c0_i32, %arg0 : i32, i32
  }
}

</mosaic_0001>

<bundles_post_ra>
// kernel: tpu_custom_call.1
= control target key start
LH: loop header
LB: loop body
LE: loop exit
PB: predicated region body
PF: predicated region fallthrough
CT: control target
= control target key end

     0   :  { %s1049_s0 = inlined_call_operand.vmem [shape: bf16[32,8], index: 0, kind: input, shape index: {}]   ;;  %s1050_s1 = inlined_call_operand.vmem [shape: bf16[128,32], index: 1, kind: input, shape index: {}]   ;;  %s1051_s2 = inlined_call_operand.vmem [shape: f32[128,1], index: 2, kind: input, shape index: {}]   ;;  %s1052_s3 = inlined_call_operand.vmem [shape: bf16[64,128], index: 3, kind: input, shape index: {}]   ;;  %s1053_s4 = inlined_call_operand.vmem [shape: f32[64,1], index: 4, kind: input, shape index: {}]   ;;  %s1054_s5 = inlined_call_operand.vmem [shape: bf16[32,64], index: 5, kind: input, shape index: {}]   ;;  %s1055_s6 = inlined_call_operand.vmem [shape: f32[32,1], index: 6, kind: input, shape index: {}]   ;;  %s1056_s7 = inlined_call_operand.vmem [shape: f32[32,1], index: 7, kind: input, shape index: {}]   ;;  %s1057_s8 = inlined_call_operand.<no memory space> [shape: f32[1,1], index: 8, kind: input, shape index: {}]   ;;  %s1058_s9 = inlined_call_operand.hbm [shape: f32[1,8], index: 9, kind: output, shape index: {}]  }
   0x1   :  { %v14_v0 = vstv %s1057_s8 }
   0x2   :  { %15 = vst [vmem:[#allocation2] sm:$0x1] %v14_v0 }
   0x3   :  { %v788_v1 = vld [vmem:[%s1049_s0] sm:$0xff]   ;;  %vm204_vm0 = vcmask 261120   ;;  %v789_v2 = vld [vmem:[%s1049_s0 + $0x8] sm:$0xff]   ;;  %v828_v4 = vmov 0   ;;  %v792_v6 = vld [vmem:[%s1050_s1 + $0x10] sm:$0xff]  }
   0x4   :  { %728 = vmatprep.subr.bf16.mxu0 %v788_v1  ;;  %v790_v3 = vld [vmem:[%s1050_s1] sm:$0xff]   ;;  %786 = vset.pattern.permute.xlu0 %v828_v4  ;;  %v791_v5 = vld [vmem:[%s1050_s1 + $0x8] sm:$0xff]   ;;  %v58_v9 = vld [vmem:[%s1051_s2 + $0x10] sm:$0xff] }
   0x5   :  { %729 = vmatpush3.bf16.msra.mxu0 %v788_v1  ;;  %787 = vset.pattern.permute.xlu1 %v828_v4  ;;  %v56_v7 = vld [vmem:[%s1051_s2] sm:$0xff]  ;;  %v57_v8 = vld [vmem:[%s1051_s2 + $0x8] sm:$0xff]  ;;  %v59_v10 = vld [vmem:[%s1051_s2 + $0x18] sm:$0xff] }
   0x6   :  { %730 = vmatprep.subr.bf16.mxu0 %v789_v2  ;;  %732 = vmatprep.mubr.msk.bf16.mxu0 %vm204_vm0, %v790_v3  ;;  %v793_v11 = vld [vmem:[%s1050_s1 + $0x18] sm:$0xff]   ;;  %v60_v12 = vld [vmem:[%s1051_s2 + $0x20] sm:$0xff]  ;;  %v61_v14 = vld [vmem:[%s1051_s2 + $0x28] sm:$0xff] }
   0x7   :  { %74 = vperm.xlu0 %786, %v56_v7   ;;  %84 = vperm.xlu1 %787, %v58_v9   ;;  %v794_v13 = vld [vmem:[%s1050_s1 + $0x20] sm:$0xff]   ;;  %v62_v15 = vld [vmem:[%s1051_s2 + $0x30] sm:$0xff]  ;;  %v795_v16 = vld [vmem:[%s1050_s1 + $0x28] sm:$0xff]  }
   0x8   :  { %v64_v17 = vld [vmem:[%s1051_s2 + $0x40] sm:$0xff]  ;;  %v63_v18 = vld [vmem:[%s1051_s2 + $0x38] sm:$0xff]  ;;  %v796_v19 = vld [vmem:[%s1050_s1 + $0x30] sm:$0xff]  }
   0x9   :  { %731 = vmatpush3.bf16.msra.mxu0 %v789_v2  ;;  %v65_v20 = vld [vmem:[%s1051_s2 + $0x48] sm:$0xff] }
   0xb   :  { %79 = vperm.xlu0 %786, %v57_v8   ;;  %89 = vperm.xlu1 %787, %v59_v10  }
   0xc   :  { %733 = vmatmul.mubr.msk.bf16.vlgmr.msra.gmra.mrb[0].mxu0 %vm204_vm0, %v791_v5 }
   0xd   :  { %736 = vmatprep.mubr.msk.bf16.mxu0 %vm204_vm0, %v792_v6 }
   0xf   :  { %94 = vperm.xlu0 %786, %v60_v12   ;;  %99 = vperm.xlu1 %787, %v61_v14  }
  0x13   :  { %104 = vperm.xlu0 %786, %v62_v15   ;;  %109 = vperm.xlu1 %787, %v63_v18  }
  0x14   :  { %737 = vmatmul.mubr.msk.bf16.gmra.mrb[4].mxu0 %vm204_vm0, %v793_v11 }
  0x15   :  { %740 = vmatprep.mubr.msk.bf16.mxu0 %vm204_vm0, %v794_v13 }
  0x17   :  { %114 = vperm.xlu0 %786, %v64_v17  }
  0x18   :  { %16 = vsyncpa [#allocation4], 0  ;;  %v66_v21 = vld [vmem:[%s1051_s2 + $0x50] sm:$0xff]  ;;  %119 = vperm.xlu1 %787, %v65_v20   ;;  %v67_v22 = vld [vmem:[%s1051_s2 + $0x58] sm:$0xff]  ;;  %vm545_vm1 = vcmask 523264   ;;  %vm633_vm2 = vcmask 64512  }
  0x19   :  { %v797_v23 = vld [vmem:[%s1050_s1 + $0x38] sm:$0xff]   ;;  %v68_v24 = vld [vmem:[%s1051_s2 + $0x60] sm:$0xff]  ;;  %v69_v25 = vld [vmem:[%s1051_s2 + $0x68] sm:$0xff]  ;;  %vm658_vm3 = vcmask 57344  }
  0x1a   :  { %v70_v26 = vld [vmem:[%s1051_s2 + $0x70] sm:$0xff]  ;;  %v71_v27 = vld [vmem:[%s1051_s2 + $0x78] sm:$0xff]  ;;  %v358_v28 = vld [vmem:[%s1053_s4] sm:$0xff] }
  0x1b   :  { %124 = vperm.xlu0 %786, %v66_v21   ;;  %v359_v29 = vld [vmem:[%s1053_s4 + $0x8] sm:$0xff]  ;;  %v360_v30 = vld [vmem:[%s1053_s4 + $0x10] sm:$0xff]  ;;  %v361_v31 = vld [vmem:[%s1053_s4 + $0x18] sm:$0xff] }
  0x1c   :  { %741 = vmatmul.mubr.msk.bf16.gmra.mrb[8].mxu0 %vm204_vm0, %v795_v16  ;;  %129 = vperm.xlu1 %787, %v67_v22   ;;  %v362_v32 = vld [vmem:[%s1053_s4 + $0x20] sm:$0xff]  ;;  %v363_v33 = vld [vmem:[%s1053_s4 + $0x28] sm:$0xff]  ;;  %v364_v34 = vld [vmem:[%s1053_s4 + $0x30] sm:$0xff] }
  0x1d   :  { %744 = vmatprep.mubr.msk.bf16.mxu0 %vm204_vm0, %v796_v19  ;;  %v365_v35 = vld [vmem:[%s1053_s4 + $0x38] sm:$0xff]  ;;  %v511_v36 = vld [vmem:[%s1055_s6] sm:$0xff]  ;;  %v512_v37 = vld [vmem:[%s1055_s6 + $0x8] sm:$0xff] }
  0x1e   :  { %v513_v38 = vld [vmem:[%s1055_s6 + $0x10] sm:$0xff]  ;;  %v514_v39 = vld [vmem:[%s1055_s6 + $0x18] sm:$0xff]  ;;  %v605_v40 = vld [vmem:[%s1056_s7] sm:$0xff] }
  0x1f   :  { %134 = vperm.xlu0 %786, %v68_v24   ;;  %v606_v41 = vld [vmem:[%s1056_s7 + $0x8] sm:$0xff]  ;;  %v607_v42 = vld [vmem:[%s1056_s7 + $0x10] sm:$0xff]  ;;  %v608_v43 = vld [vmem:[%s1056_s7 + $0x18] sm:$0xff] }
  0x20   :  { %139 = vperm.xlu1 %787, %v69_v25   ;;  %v647_v44 = vld [vmem:[#allocation2] sm:$0x1] }
  0x21   :  { %v798_v45 = vld [vmem:[%s1052_s3] sm:$0xff]  }
  0x22   :  { %764 = vmatprep.mubr.bf16.mxu1 %v798_v45 }
  0x23   :  { %144 = vperm.xlu0 %786, %v70_v26  }
  0x24   :  { %745 = vmatmul.mubr.msk.bf16.gmra.mrb[12].mxu0 %vm204_vm0, %v797_v23  ;;  %149 = vperm.xlu1 %787, %v71_v27  }
  0x27   :  { %368 = vperm.xlu0 %786, %v358_v28  }
  0x28   :  { %373 = vperm.xlu1 %787, %v359_v29  }
  0x2b   :  { %378 = vperm.xlu0 %786, %v360_v30  }
  0x2c   :  { %383 = vperm.xlu1 %787, %v361_v31  }
  0x2f   :  { %388 = vperm.xlu0 %786, %v362_v32  }
  0x30   :  { %393 = vperm.xlu1 %787, %v363_v33  }
  0x33   :  { %398 = vperm.xlu0 %786, %v364_v34  }
  0x34   :  { %403 = vperm.xlu1 %787, %v365_v35  }
  0x37   :  { %517 = vperm.xlu0 %786, %v511_v36  }
  0x38   :  { %522 = vperm.xlu1 %787, %v512_v37  }
  0x3b   :  { %527 = vperm.xlu0 %786, %v513_v38  }
  0x3c   :  { %532 = vperm.xlu1 %787, %v514_v39  }
  0x3f   :  { %611 = vperm.xlu0 %786, %v605_v40  }
  0x40   :  { %616 = vperm.xlu1 %787, %v606_v41  }
  0x43   :  { %621 = vperm.xlu0 %786, %v607_v42  }
  0x44   :  { %626 = vperm.xlu1 %787, %v608_v43  }
  0x47   :  { %650 = vperm.xlu0 %786, %v647_v44  }
  0x86   :  { %v75_v46 = vpop.permute.xlu0 %74  ;;  %v85_v47 = vpop.permute.xlu1 %84 }
  0x8a   :  { %v80_v48 = vpop.permute.xlu0 %79  ;;  %v90_v49 = vpop.permute.xlu1 %89 }
  0x8e   :  { %v95_v50 = vpop.permute.xlu0 %94  ;;  %v100_v51 = vpop.permute.xlu1 %99 }
  0x92   :  { %v105_v52 = vpop.permute.xlu0 %104  ;;  %v110_v56 = vpop.permute.xlu1 %109 }
  0x96   :  { %v115_v0 = vpop.permute.xlu0 %114 }
  0x97   :  { %v120_v4 = vpop.permute.xlu1 %119 }
  0x9a   :  { %v125_v13 = vpop.permute.xlu0 %124 }
  0x9b   :  { %v130_v17 = vpop.permute.xlu1 %129 }
  0x9e   :  { %v135_v25 = vpop.permute.xlu0 %134 }
  0x9f   :  { %v140_v30 = vpop.permute.xlu1 %139 }
  0xa2   :  { %v145_v37 = vpop.permute.xlu0 %144 }
  0xa3   :  { %v150_v42 = vpop.permute.xlu1 %149 }
  0xdf   :  { %v734_v53 = vpop.f32.mrb[0].mxu0 }
  0xe0   :  { %v272_v54 = vadd.f32 %v734_v53, %v85_v47  ;;  %v263_v55 = vpop.f32.mrb[1].mxu0 }
  0xe1   :  { %v264_v57 = vadd.f32 %v263_v55, %v75_v46  ;;  %v735_v58 = vpop.f32.mrb[2].mxu0  ;;  %v800_v55 = vld [vmem:[%s1052_s3 + $0x10] sm:$0xff]  }
  0xe2   :  { %v275_v59 = vadd.f32 %v735_v58, %v90_v49  ;;  %v266_v60 = vpop.f32.mrb[3].mxu0  ;;  %v328_v62 = vmax.f32 %v272_v54, 0.0  ;;  %v799_v54 = vld [vmem:[%s1052_s3 + $0x8] sm:$0xff]   ;;  %v369_v58 = vpop.permute.xlu0 %368 }
  0xe3   :  { %v267_v61 = vadd.f32 %v266_v60, %v80_v48  ;;  %v326_v1 = vmax.f32 %v264_v57, 0.0  ;;  %v802_v57 = vld [vmem:[%s1054_s5] sm:$0xff]  }
  0xe4   :  { %v329_v63 = vmax.f32 %v275_v59, 0.0  ;;  %780 = vmatprep.mubr.msk.bf16.mxu0 %vm545_vm1, %v802_v57  ;;  %v374_v59 = vpop.permute.xlu1 %373 }
  0xe5   :  { %v327_v2 = vmax.f32 %v267_v61, 0.0 }
  0xe6   :  { %v351_v3 = vpack.c.bf16 %v329_v63, %v328_v62  ;;  %v379_v60 = vpop.permute.xlu0 %378 }
  0xe7   :  { %v738_v5 = vpop.f32.mrb[4].mxu0  ;;  %v350_v6 = vpack.c.bf16 %v327_v2, %v326_v1 }
  0xe8   :  { %v288_v7 = vadd.f32 %v738_v5, %v105_v52  ;;  %v279_v8 = vpop.f32.mrb[5].mxu0  ;;  %v384_v61 = vpop.permute.xlu1 %383 }
  0xe9   :  { %v280_v9 = vadd.f32 %v279_v8, %v95_v50  ;;  %v739_v10 = vpop.f32.mrb[6].mxu0  ;;  %748 = vmatprep.subr.bf16.mxu1 %v350_v6 }
  0xea   :  { %v291_v11 = vadd.f32 %v739_v10, %v110_v56  ;;  %v282_v12 = vpop.f32.mrb[7].mxu0  ;;  %749 = vmatpush3.bf16.msra.mxu1 %v350_v6  ;;  %v332_v15 = vmax.f32 %v288_v7, 0.0  ;;  %v801_v56 = vld [vmem:[%s1052_s3 + $0x18] sm:$0xff]   ;;  %v389_v1 = vpop.permute.xlu0 %388 }
  0xeb   :  { %v283_v14 = vadd.f32 %v282_v12, %v100_v51  ;;  %750 = vmatprep.subr.bf16.mxu1 %v351_v3  ;;  %v330_v18 = vmax.f32 %v280_v9, 0.0 }
  0xec   :  { %v333_v16 = vmax.f32 %v291_v11, 0.0  ;;  %v394_v6 = vpop.permute.xlu1 %393 }
  0xed   :  { %v331_v19 = vmax.f32 %v283_v14, 0.0 }
  0xee   :  { %v353_v20 = vpack.c.bf16 %v333_v16, %v332_v15  ;;  %751 = vmatpush3.bf16.msra.mxu1 %v351_v3 }
  0xef   :  { %v352_v21 = vpack.c.bf16 %v331_v19, %v330_v18  ;;  %v742_v22 = vpop.f32.mrb[8].mxu0 }
  0xf0   :  { %v304_v23 = vadd.f32 %v742_v22, %v125_v13  ;;  %v295_v24 = vpop.f32.mrb[9].mxu0  ;;  %v399_v13 = vpop.permute.xlu0 %398 }
  0xf1   :  { %v296_v26 = vadd.f32 %v295_v24, %v115_v0  ;;  %v743_v27 = vpop.f32.mrb[10].mxu0  ;;  %752 = vmatprep.subr.bf16.mxu1 %v352_v21  ;;  %v404_v18 = vpop.permute.xlu1 %403 }
  0xf2   :  { %v307_v28 = vadd.f32 %v743_v27, %v130_v17  ;;  %v298_v29 = vpop.f32.mrb[11].mxu0  ;;  %753 = vmatpush3.bf16.msra.mxu1 %v352_v21  ;;  %v336_v32 = vmax.f32 %v304_v23, 0.0 }
  0xf3   :  { %v299_v31 = vadd.f32 %v298_v29, %v120_v4  ;;  %754 = vmatprep.subr.bf16.mxu1 %v353_v20  ;;  %v334_v34 = vmax.f32 %v296_v26, 0.0 }
  0xf4   :  { %v337_v33 = vmax.f32 %v307_v28, 0.0 }
  0xf5   :  { %v335_v35 = vmax.f32 %v299_v31, 0.0  ;;  %v518_v31 = vpop.permute.xlu0 %517 }
  0xf6   :  { %v355_v36 = vpack.c.bf16 %v337_v33, %v336_v32  ;;  %755 = vmatpush3.bf16.msra.mxu1 %v353_v20  ;;  %v523_v32 = vpop.permute.xlu1 %522 }
  0xf7   :  { %v354_v38 = vpack.c.bf16 %v335_v35, %v334_v34  ;;  %v746_v39 = vpop.f32.mrb[12].mxu0 }
  0xf8   :  { %v320_v40 = vadd.f32 %v746_v39, %v145_v37  ;;  %v311_v41 = vpop.f32.mrb[13].mxu0 }
  0xf9   :  { %v312_v43 = vadd.f32 %v311_v41, %v135_v25  ;;  %v747_v44 = vpop.f32.mrb[14].mxu0  ;;  %756 = vmatprep.subr.bf16.mxu1 %v354_v38  ;;  %v528_v33 = vpop.permute.xlu0 %527 }
  0xfa   :  { %v323_v45 = vadd.f32 %v747_v44, %v150_v42  ;;  %v314_v46 = vpop.f32.mrb[15].mxu0  ;;  %757 = vmatpush3.bf16.msra.mxu1 %v354_v38  ;;  %v340_v48 = vmax.f32 %v320_v40, 0.0  ;;  %v533_v34 = vpop.permute.xlu1 %532 }
  0xfb   :  { %v315_v47 = vadd.f32 %v314_v46, %v140_v30  ;;  %758 = vmatprep.subr.bf16.mxu1 %v355_v36  ;;  %v338_v50 = vmax.f32 %v312_v43, 0.0  ;;  %v803_v30 = vld [vmem:[%s1054_s5 + $0x8] sm:$0xff]   ;;  %s829_s5 = smov [#allocation3]  }
  0xfc   :  { %v341_v49 = vmax.f32 %v323_v45, 0.0  ;;  %s666_s28 = sshll.u32 %s829_s5, 4  ;;  %s667_s28 = int_to_ptr.vmem [resolvable:$true] %s666_s28 }
  0xfd   :  { %v339_v51 = vmax.f32 %v315_v47, 0.0  ;;  %s804_s29 = scalar_lea.vmem %s667_s28, 16  ;;  %s808_s30 = scalar_lea.vmem %s667_s28, 32 }
  0xfe   :  { %v357_v52 = vpack.c.bf16 %v341_v49, %v340_v48  ;;  %759 = vmatpush3.bf16.msra.mxu1 %v355_v36  ;;  %v612_v36 = vpop.permute.xlu0 %611  ;;  %v617_v41 = vpop.permute.xlu1 %616  ;;  %p805_p0 = scmp.ne.s32.totalorder %s667_s28, %s804_s29  ;;  %p809_p1 = scmp.lt.s32.totalorder %s667_s28, %s667_s28 }
  0xff   :  { %v356_v53 = vpack.c.bf16 %v339_v51, %v338_v50  ;;  %p810_p2 = scmp.lt.s32.totalorder %s808_s30, %s804_s29 }
 0x101   :  { %760 = vmatprep.subr.bf16.mxu1 %v356_v53  ;;  %p811_p3 = por %p810_p2, %p809_p1 }
 0x102   :  { %761 = vmatpush3.bf16.msra.mxu1 %v356_v53  ;;  %v622_v50 = vpop.permute.xlu0 %621  ;;  %v627_v53 = vpop.permute.xlu1 %626 }
 0x103   :  { %762 = vmatprep.subr.bf16.mxu1 %v357_v52  ;;  %p812_p4 = pnand %p811_p3, %p805_p0 }
 0x106   :  { %763 = vmatpush3.bf16.msra.mxu1 %v357_v52 }
 0x109   :  { %765 = vmatmul.mubr.bf16.vlgmr.msra.gmra.mrb[0].mxu1 %v799_v54 }
 0x10a   :  { %768 = vmatprep.mubr.bf16.mxu1 %v800_v55 }
 0x111   :  { %769 = vmatmul.mubr.bf16.gmra.mrb[4].mxu1 %v801_v56 }
 0x1dc   :  { %v766_v62 = vpop.f32.mrb[0].mxu1 }
 0x1dd   :  { %v473_v63 = vadd.f32 %v766_v62, %v379_v60  ;;  %v464_v0 = vpop.f32.mrb[1].mxu1 }
 0x1de   :  { %v465_v2 = vadd.f32 %v464_v0, %v369_v58  ;;  %v767_v3 = vpop.f32.mrb[2].mxu1 }
 0x1df   :  { %v476_v4 = vadd.f32 %v767_v3, %v384_v61  ;;  %v467_v5 = vpop.f32.mrb[3].mxu1  ;;  %v497_v8 = vmax.f32 %v473_v63, 0.0  ;;  %v653_v61 = vlaneseq }
 0x1e0   :  { %v468_v7 = vadd.f32 %v467_v5, %v374_v59  ;;  %v495_v10 = vmax.f32 %v465_v2, 0.0  ;;  %v651_v5 = vpop.permute.xlu0 %650 }
 0x1e1   :  { %v498_v9 = vmax.f32 %v476_v4, 0.0  ;;  %v654_v0 = vshrl.u32 %v653_v61, 7 }
 0x1e2   :  { %v496_v11 = vmax.f32 %v468_v7, 0.0 }
 0x1e3   :  { %v508_v12 = vpack.c.bf16 %v498_v9, %v497_v8  ;;  %v655_v3 = vsub.s32 0, %v654_v0 }
 0x1e4   :  { %v507_v14 = vpack.c.bf16 %v496_v11, %v495_v10  ;;  %v770_v15 = vpop.f32.mrb[4].mxu1 }
 0x1e5   :  { %v489_v16 = vadd.f32 %v770_v15, %v399_v13  ;;  %v480_v17 = vpop.f32.mrb[5].mxu1  ;;  %v656_v7 = vrot.slane %v651_v5, %v655_v3 }
 0x1e6   :  { %v481_v19 = vadd.f32 %v480_v17, %v389_v1  ;;  %v771_v20 = vpop.f32.mrb[6].mxu1  ;;  %772 = vmatprep.subr.bf16.mxu0 %v507_v14 }
 0x1e7   :  { %v492_v21 = vadd.f32 %v771_v20, %v404_v18  ;;  %v483_v22 = vpop.f32.mrb[7].mxu1  ;;  %773 = vmatpush3.bf16.msra.mxu0 %v507_v14  ;;  %v501_v24 = vmax.f32 %v489_v16, 0.0 }
 0x1e8   :  { %v484_v23 = vadd.f32 %v483_v22, %v394_v6  ;;  %774 = vmatprep.subr.bf16.mxu0 %v508_v12  ;;  %v499_v26 = vmax.f32 %v481_v19, 0.0 }
 0x1e9   :  { %v502_v25 = vmax.f32 %v492_v21, 0.0 }
 0x1ea   :  { %v500_v27 = vmax.f32 %v484_v23, 0.0 }
 0x1eb   :  { %v510_v28 = vpack.c.bf16 %v502_v25, %v501_v24  ;;  %775 = vmatpush3.bf16.msra.mxu0 %v508_v12 }
 0x1ec   :  { %v509_v29 = vpack.c.bf16 %v500_v27, %v499_v26 }
 0x1ee   :  { %776 = vmatprep.subr.bf16.mxu0 %v509_v29 }
 0x1ef   :  { %777 = vmatpush3.bf16.msra.mxu0 %v509_v29 }
 0x1f0   :  { %778 = vmatprep.subr.bf16.mxu0 %v510_v28 }
 0x1f3   :  { %779 = vmatpush3.bf16.msra.mxu0 %v510_v28 }
 0x1f6   :  { %781 = vmatmul.mubr.msk.bf16.vlgmr.msra.gmra.mrb[16].mxu0 %vm545_vm1, %v803_v30 }
 0x2c9   :  { %v782_v35 = vpop.f32.mrb[16].mxu0 }
 0x2ca   :  { %v595_v37 = vadd.f32 %v782_v35, %v528_v33  ;;  %v586_v38 = vpop.f32.mrb[17].mxu0 }
 0x2cb   :  { %v587_v39 = vadd.f32 %v586_v38, %v518_v31  ;;  %v783_v40 = vpop.f32.mrb[18].mxu0 }
 0x2cc   :  { %v598_v42 = vadd.f32 %v783_v40, %v533_v34  ;;  %v589_v43 = vpop.f32.mrb[19].mxu0  ;;  %v603_v44 = vmax.f32 %v595_v37, 0.0 }
 0x2cd   :  { %v601_v45 = vmax.f32 %v587_v39, 0.0  ;;  %v590_v46 = vadd.f32 %v589_v43, %v523_v32 }
 0x2ce   :  { %v604_v48 = vmax.f32 %v598_v42, 0.0  ;;  %v631_v51 = vmul.f32 %v622_v50, %v603_v44 }
 0x2cf   :  { %v629_v47 = vmul.f32 %v612_v36, %v601_v45  ;;  %v602_v49 = vmax.f32 %v590_v46, 0.0 }
 0x2d0   :  { %v632_v55 = vmul.f32 %v627_v53, %v604_v48  ;;  %v637_v58 = vsel %vm633_vm2, %v631_v51, 0.0 }
 0x2d1   :  { %v630_v52 = vmul.f32 %v617_v41, %v602_v49  ;;  %v634_v54 = vsel %vm633_vm2, %v629_v47, 0.0 }
 0x2d2   :  { %v639_v60 = vsel %vm633_vm2, %v632_v55, 0.0 }
 0x2d3   :  { %v635_v56 = vsel %vm633_vm2, %v630_v52, 0.0 }
 0x2d4   :  { %v636_v57 = vadd.f32 %v635_v56, %v634_v54 }
 0x2d6   :  { %v638_v59 = vadd.f32 %v637_v58, %v636_v57 }
 0x2d8   :  { %v640_v62 = vadd.f32 %v639_v60, %v638_v59 }
 0x2da   :  { %v641_v63 = vrot.slane %v640_v62, 4 }
 0x2dc   :  { %v642_v1 = vadd.f32 %v641_v63, %v640_v62 }
 0x2de   :  { %v643_v2 = vrot.slane %v642_v1, 2 }
 0x2e0   :  { %v644_v4 = vadd.f32 %v643_v2, %v642_v1 }
 0x2e2   :  { %v645_v6 = vrot.slane %v644_v4, 1 }
 0x2e4   :  { %v646_v8 = vadd.f32 %v645_v6, %v644_v4 }
 0x2e6   :  { %v657_v9 = vadd.f32 %v656_v7, %v646_v8 }
 0x2e8   :  { %659 = vst.msk [vmem:[#allocation3] sm:$0x1] %vm658_vm3, %v657_v9 }
 0x2e9   :  { %815 = shalt.err (!%p812_p4)
}
 0x2ea   :  { %s816_s12 = scalar_lea.hbm %s1058_s9, 16 }
 0x2eb   :  { %p817_p5 = scmp.ne.s32.totalorder %s1058_s9, %s816_s12  ;;  %p820_p6 = scmp.lt.u32.totalorder %s816_s12, %s1058_s9 }
 0x2ed   :  { %p822_p7 = pnand %p820_p6, %p817_p5 }
 0x2ef   :  { %825 = shalt.err (!%p822_p7)
}
 0x2f0   :  { %669 = dma.vmem_to_hbm [thread:$0]  %s667_s28, 16, %s1058_s9, [#allocation4]  }
 0x2f1   :  { %826 = dma.done.wait [#allocation4], 16  }
 0x2f2   :  { %827 = vsyncadd [#allocation4], 4294967280 }
 0x2f3   :  { %673 = vsyncpa [#allocation4], 1 }

</bundles_post_ra>
